<compile_context>
chip_gen: v7x
topology: tpu7x:2x2x1
jax: 0.10.0
libtpu: 0.0.40
codegen_flags: <defaults>
</compile_context>

<pallas_src>
import jax
import jax.numpy as jnp
from jax.experimental import pallas as pl
from jax.experimental.pallas import tpu as pltpu

# ---- model hyper-parameters (small, consistent with the module) ----
B = 2            # batch
N = 8            # sequence length (tokens)
C = 32           # embedding dim
NUM_HEADS = 4
HEAD_DIM = C // NUM_HEADS
MLP_RATIO = 4.0
HIDDEN = int(C * MLP_RATIO)
SCALE = HEAD_DIM ** (-0.5)   # folded into the Q columns of wqkv at init
LN_EPS = 1e-5                # nn.LayerNorm default
M = B * N                    # rows for all GEMMs

_INV_SQRT2 = 0.7071067811865476


def _layernorm(x, gamma, beta):
    # single-pass stats: var = E[x^2] - mu^2 ; fused rsqrt*gamma scale
    mu = jnp.mean(x, axis=-1, keepdims=True)
    var = jnp.mean(x * x, axis=-1, keepdims=True) - mu * mu
    inv = jax.lax.rsqrt(var + LN_EPS)
    return (x - mu) * (inv * gamma) + beta


def _erf(x):
    # Abramowitz & Stegun 7.1.26, max abs err ~1.5e-7 (f32-exact for GELU use).
    # Built only from VPU ops + one EUP exp -> always lowers in Mosaic.
    a1, a2, a3, a4, a5 = 0.254829592, -0.284496736, 1.421413741, -1.453152027, 1.061405429
    p = 0.3275911
    ax = jnp.abs(x)
    t = 1.0 / (1.0 + p * ax)
    poly = ((((a5 * t + a4) * t + a3) * t + a2) * t + a1) * t
    y = 1.0 - poly * jnp.exp(-ax * ax)
    return jnp.where(x < 0.0, -y, y)


def _gelu_exact(x):
    # nn.GELU default (approximate='none'): 0.5*x*(1+erf(x/sqrt(2)))
    return 0.5 * x * (1.0 + _erf(x * _INV_SQRT2))


def block_kernel(x_ref,
                 g1_ref, b1_ref,          # norm1 weight / bias        (1, C)
                 wqkv_ref,                # qkv weight (C, 3C), scale pre-folded, no bias
                 wproj_ref, bproj_ref,    # attn.proj weight (C, C), bias (1, C)
                 g2_ref, b2_ref,          # norm2 weight / bias        (1, C)
                 w1_ref, bfc1_ref,        # mlp.fc1 weight (C, H), bias (1, H)
                 w2_ref, bfc2_ref,        # mlp.fc2 weight (H, C), bias (1, C)
                 o_ref):
    x = x_ref[...]                                             # (M, C), M = B*N

    # ---------- LayerNorm 1 ----------
    h1 = _layernorm(x, g1_ref[...], b1_ref[...])               # (M, C)

    # ---------- Attention ----------
    # one QKV GEMM over all B*N rows
    qkv = jnp.dot(h1, wqkv_ref[...], preferred_element_type=jnp.float32)   # (M, 3C)

    # pack every (head, batch) pair into one leading batch axis z = head*B + batch.
    # Only tile-aligned leading-dim reshapes + leading-axis concat (no lane merges).
    def heads(base):
        parts = []
        for hd in range(NUM_HEADS):
            sl = qkv[:, base + hd * HEAD_DIM: base + (hd + 1) * HEAD_DIM]  # (M, Dh)
            parts.append(sl.reshape(B, N, HEAD_DIM))                       # (B, N, Dh)
        return jnp.concatenate(parts, axis=0)                              # (H*B, N, Dh)

    q = heads(0 * C)      # scale already folded into these columns of wqkv
    k = heads(1 * C)
    v = heads(2 * C)

    # batched scores / single softmax / weighted sum for all H*B pairs at once
    s = jnp.einsum('znd,zmd->znm', q, k,
                   preferred_element_type=jnp.float32)                     # (H*B, N, N)
    s = s - jnp.max(s, axis=-1, keepdims=True)
    p = jnp.exp(s)
    p = p / jnp.sum(p, axis=-1, keepdims=True)                             # exact softmax
    o = jnp.einsum('znm,zmd->znd', p, v,
                   preferred_element_type=jnp.float32)                     # (H*B, N, Dh)

    # output projection: lane-axis concat over heads replaced by the equivalent
    # sum of per-head partial products  sum_h O_h @ Wproj[h*Dh:(h+1)*Dh, :]
    wproj = wproj_ref[...]                                                 # (C, C)
    attn = jnp.dot(o[0:B].reshape(M, HEAD_DIM), wproj[0:HEAD_DIM, :],
                   preferred_element_type=jnp.float32)
    for hd in range(1, NUM_HEADS):
        attn = attn + jnp.dot(o[hd * B:(hd + 1) * B].reshape(M, HEAD_DIM),
                              wproj[hd * HEAD_DIM:(hd + 1) * HEAD_DIM, :],
                              preferred_element_type=jnp.float32)
    attn = attn + bproj_ref[...]

    x1 = x + attn                                              # residual 1

    # ---------- LayerNorm 2 ----------
    h2 = _layernorm(x1, g2_ref[...], b2_ref[...])

    # ---------- MLP ----------
    m = jnp.dot(h2, w1_ref[...], preferred_element_type=jnp.float32) + bfc1_ref[...]
    m = _gelu_exact(m)
    m = jnp.dot(m, w2_ref[...], preferred_element_type=jnp.float32) + bfc2_ref[...]

    o_ref[...] = x1 + m                                        # residual 2


def block_forward(x, params):
    (g1, b1, wqkv, wproj, bproj, g2, b2, w1, bfc1, w2, bfc2) = params

    xf = x.reshape(M, C)          # wrapper-side flatten (free) -> M = B*N rows

    def full(a):
        nd = a.ndim
        return pl.BlockSpec(a.shape, lambda i, _nd=nd: (0,) * _nd)

    out = pl.pallas_call(
        block_kernel,
        out_shape=jax.ShapeDtypeStruct((M, C), jnp.float32),
        grid_spec=pltpu.PrefetchScalarGridSpec(
            num_scalar_prefetch=0,
            grid=(1,),                                  # batch grid collapsed
            in_specs=[
                full(xf),                               # activations, (B*N, C)
                full(g1), full(b1),                     # norm1
                full(wqkv),                             # qkv weight (scale folded)
                full(wproj), full(bproj),               # proj
                full(g2), full(b2),                     # norm2
                full(w1), full(bfc1),                   # fc1
                full(w2), full(bfc2),                   # fc2
            ],
            out_specs=pl.BlockSpec((M, C), lambda i: (0, 0)),
        ),
        # single-core by choice: at this size per-core compute << per-step overhead.
        # If N/C grow, reintroduce a leading "parallel" batch axis for v7x's 2 TCs.
        compiler_params=pltpu.CompilerParams(
            dimension_semantics=("arbitrary",)),
    )(xf, g1, b1, wqkv, wproj, bproj, g2, b2, w1, bfc1, w2, bfc2)

    return out.reshape(B, N, C)


def init_params(key):
    ks = jax.random.split(key, 8)
    std = 0.02
    g1 = jnp.ones((1, C), jnp.float32)
    b1 = jnp.zeros((1, C), jnp.float32)
    wqkv = jax.random.normal(ks[0], (C, 3 * C), jnp.float32) * std   # qkv_bias=False
    # fold qk scale (head_dim**-0.5) into the Q columns once, outside the kernel
    wqkv = wqkv.at[:, :C].set(wqkv[:, :C] * SCALE)
    wproj = jax.random.normal(ks[1], (C, C), jnp.float32) * std
    bproj = jax.random.normal(ks[2], (1, C), jnp.float32) * std
    g2 = jnp.ones((1, C), jnp.float32)
    b2 = jnp.zeros((1, C), jnp.float32)
    w1 = jax.random.normal(ks[3], (C, HIDDEN), jnp.float32) * std
    bfc1 = jax.random.normal(ks[4], (1, HIDDEN), jnp.float32) * std
    w2 = jax.random.normal(ks[5], (HIDDEN, C), jnp.float32) * std
    bfc2 = jax.random.normal(ks[6], (1, C), jnp.float32) * std
    return (g1, b1, wqkv, wproj, bproj, g2, b2, w1, bfc1, w2, bfc2)


if __name__ == "__main__":
    key = jax.random.PRNGKey(0)
    kx, kp = jax.random.split(key)
    x = jax.random.normal(kx, (B, N, C), jnp.float32)
    params = init_params(kp)

    out = block_forward(x, params)
    jax.block_until_ready(out)
    assert out.shape == (B, N, C)
    print("KERNEL_OK")
</pallas_src>

<mosaic_0001>
module attributes {stable_mosaic.version = 11 : i64} {
  func.func @block_kernel(%arg0: i32, %arg1: memref<16x32xf32, #tpu.memory_space<vmem>>, %arg2: memref<1x32xf32, #tpu.memory_space<vmem>>, %arg3: memref<1x32xf32, #tpu.memory_space<vmem>>, %arg4: memref<32x96xf32, #tpu.memory_space<vmem>>, %arg5: memref<32x32xf32, #tpu.memory_space<vmem>>, %arg6: memref<1x32xf32, #tpu.memory_space<vmem>>, %arg7: memref<1x32xf32, #tpu.memory_space<vmem>>, %arg8: memref<1x32xf32, #tpu.memory_space<vmem>>, %arg9: memref<32x128xf32, #tpu.memory_space<vmem>>, %arg10: memref<1x128xf32, #tpu.memory_space<vmem>>, %arg11: memref<128x32xf32, #tpu.memory_space<vmem>>, %arg12: memref<1x32xf32, #tpu.memory_space<vmem>>, %arg13: memref<16x32xf32, #tpu.memory_space<vmem>>) attributes {dimension_semantics = [#tpu.dimension_semantics<arbitrary>], iteration_bounds = array<i64: 1>, scalar_prefetch = 0 : i64, scratch_operands = 0 : i64, tpu.core_type = #tpu.core_type<tc>, window_params = [{pipeline_mode = #tpu.pipeline_mode<synchronous>, transform_indices = @transform_0, window_bounds = array<i64: 16, 32>}, {pipeline_mode = #tpu.pipeline_mode<synchronous>, transform_indices = @transform_1, window_bounds = array<i64: 1, 32>}, {pipeline_mode = #tpu.pipeline_mode<synchronous>, transform_indices = @transform_2, window_bounds = array<i64: 1, 32>}, {pipeline_mode = #tpu.pipeline_mode<synchronous>, transform_indices = @transform_3, window_bounds = array<i64: 32, 96>}, {pipeline_mode = #tpu.pipeline_mode<synchronous>, transform_indices = @transform_4, window_bounds = array<i64: 32, 32>}, {pipeline_mode = #tpu.pipeline_mode<synchronous>, transform_indices = @transform_5, window_bounds = array<i64: 1, 32>}, {pipeline_mode = #tpu.pipeline_mode<synchronous>, transform_indices = @transform_6, window_bounds = array<i64: 1, 32>}, {pipeline_mode = #tpu.pipeline_mode<synchronous>, transform_indices = @transform_7, window_bounds = array<i64: 1, 32>}, {pipeline_mode = #tpu.pipeline_mode<synchronous>, transform_indices = @transform_8, window_bounds = array<i64: 32, 128>}, {pipeline_mode = #tpu.pipeline_mode<synchronous>, transform_indices = @transform_9, window_bounds = array<i64: 1, 128>}, {pipeline_mode = #tpu.pipeline_mode<synchronous>, transform_indices = @transform_10, window_bounds = array<i64: 128, 32>}, {pipeline_mode = #tpu.pipeline_mode<synchronous>, transform_indices = @transform_11, window_bounds = array<i64: 1, 32>}, {pipeline_mode = #tpu.pipeline_mode<synchronous>, transform_indices = @transform_12, window_bounds = array<i64: 16, 32>}]} {
    %c0 = arith.constant 0 : index
    %c0_0 = arith.constant 0 : index
    %0 = vector.load %arg1[%c0, %c0_0] : memref<16x32xf32, #tpu.memory_space<vmem>>, vector<16x32xf32>
    %c0_1 = arith.constant 0 : index
    %c0_2 = arith.constant 0 : index
    %1 = vector.load %arg2[%c0_1, %c0_2] : memref<1x32xf32, #tpu.memory_space<vmem>>, vector<1x32xf32>
    %c0_3 = arith.constant 0 : index
    %c0_4 = arith.constant 0 : index
    %2 = vector.load %arg3[%c0_3, %c0_4] : memref<1x32xf32, #tpu.memory_space<vmem>>, vector<1x32xf32>
    %cst = arith.constant dense<0.000000e+00> : vector<16xf32>
    %3 = vector.multi_reduction <add>, %0, %cst [1] : vector<16x32xf32> to vector<16xf32>
    %4 = vector.shape_cast %3 : vector<16xf32> to vector<16x1xf32>
    %cst_5 = arith.constant 3.200000e+01 : f32
    %5 = vector.broadcast %cst_5 : f32 to vector<16x1xf32>
    %6 = arith.divf %4, %5 : vector<16x1xf32>
    %7 = arith.mulf %0, %0 : vector<16x32xf32>
    %cst_6 = arith.constant dense<0.000000e+00> : vector<16xf32>
    %8 = vector.multi_reduction <add>, %7, %cst_6 [1] : vector<16x32xf32> to vector<16xf32>
    %9 = vector.shape_cast %8 : vector<16xf32> to vector<16x1xf32>
    %cst_7 = arith.constant 3.200000e+01 : f32
    %10 = vector.broadcast %cst_7 : f32 to vector<16x1xf32>
    %11 = arith.divf %9, %10 : vector<16x1xf32>
    %12 = arith.mulf %6, %6 : vector<16x1xf32>
    %13 = arith.subf %11, %12 : vector<16x1xf32>
    %cst_8 = arith.constant 9.99999974E-6 : f32
    %14 = vector.broadcast %cst_8 : f32 to vector<16x1xf32>
    %15 = arith.addf %13, %14 : vector<16x1xf32>
    %16 = math.rsqrt %15 : vector<16x1xf32>
    %17 = vector.broadcast %6 : vector<16x1xf32> to vector<16x32xf32>
    %18 = arith.subf %0, %17 : vector<16x32xf32>
    %19 = vector.broadcast %16 : vector<16x1xf32> to vector<16x32xf32>
    %20 = vector.broadcast %1 : vector<1x32xf32> to vector<16x32xf32>
    %21 = arith.mulf %19, %20 : vector<16x32xf32>
    %22 = arith.mulf %18, %21 : vector<16x32xf32>
    %23 = vector.broadcast %2 : vector<1x32xf32> to vector<16x32xf32>
    %24 = arith.addf %22, %23 : vector<16x32xf32>
    %c0_9 = arith.constant 0 : index
    %c0_10 = arith.constant 0 : index
    %25 = vector.load %arg4[%c0_9, %c0_10] : memref<32x96xf32, #tpu.memory_space<vmem>>, vector<32x96xf32>
    %cst_11 = arith.constant dense<0.000000e+00> : vector<16x96xf32>
    %26 = tpu.matmul %24, %25, %cst_11 {dimension_numbers = #tpu.dot_dimension_numbers<[1], [0], [0], [1], [0, 0, 1, 1], [], []>} : vector<16x32xf32>, vector<32x96xf32>, vector<16x96xf32> -> vector<16x96xf32>
    %27 = vector.extract_strided_slice %26 {offsets = [0, 0], sizes = [16, 8], strides = [1, 1]} : vector<16x96xf32> to vector<16x8xf32>
    %28 = vector.shape_cast %27 : vector<16x8xf32> to vector<2x8x8xf32>
    %29 = vector.extract_strided_slice %26 {offsets = [0, 8], sizes = [16, 8], strides = [1, 1]} : vector<16x96xf32> to vector<16x8xf32>
    %30 = vector.shape_cast %29 : vector<16x8xf32> to vector<2x8x8xf32>
    %31 = vector.extract_strided_slice %26 {offsets = [0, 16], sizes = [16, 8], strides = [1, 1]} : vector<16x96xf32> to vector<16x8xf32>
    %32 = vector.shape_cast %31 : vector<16x8xf32> to vector<2x8x8xf32>
    %33 = vector.extract_strided_slice %26 {offsets = [0, 24], sizes = [16, 8], strides = [1, 1]} : vector<16x96xf32> to vector<16x8xf32>
    %34 = vector.shape_cast %33 : vector<16x8xf32> to vector<2x8x8xf32>
    %35 = tpu.concatenate %28, %30, %32, %34 in 0 : vector<2x8x8xf32>, vector<2x8x8xf32>, vector<2x8x8xf32>, vector<2x8x8xf32> -> vector<8x8x8xf32>
    %36 = vector.extract_strided_slice %26 {offsets = [0, 32], sizes = [16, 8], strides = [1, 1]} : vector<16x96xf32> to vector<16x8xf32>
    %37 = vector.shape_cast %36 : vector<16x8xf32> to vector<2x8x8xf32>
    %38 = vector.extract_strided_slice %26 {offsets = [0, 40], sizes = [16, 8], strides = [1, 1]} : vector<16x96xf32> to vector<16x8xf32>
    %39 = vector.shape_cast %38 : vector<16x8xf32> to vector<2x8x8xf32>
    %40 = vector.extract_strided_slice %26 {offsets = [0, 48], sizes = [16, 8], strides = [1, 1]} : vector<16x96xf32> to vector<16x8xf32>
    %41 = vector.shape_cast %40 : vector<16x8xf32> to vector<2x8x8xf32>
    %42 = vector.extract_strided_slice %26 {offsets = [0, 56], sizes = [16, 8], strides = [1, 1]} : vector<16x96xf32> to vector<16x8xf32>
    %43 = vector.shape_cast %42 : vector<16x8xf32> to vector<2x8x8xf32>
    %44 = tpu.concatenate %37, %39, %41, %43 in 0 : vector<2x8x8xf32>, vector<2x8x8xf32>, vector<2x8x8xf32>, vector<2x8x8xf32> -> vector<8x8x8xf32>
    %45 = vector.extract_strided_slice %26 {offsets = [0, 64], sizes = [16, 8], strides = [1, 1]} : vector<16x96xf32> to vector<16x8xf32>
    %46 = vector.shape_cast %45 : vector<16x8xf32> to vector<2x8x8xf32>
    %47 = vector.extract_strided_slice %26 {offsets = [0, 72], sizes = [16, 8], strides = [1, 1]} : vector<16x96xf32> to vector<16x8xf32>
    %48 = vector.shape_cast %47 : vector<16x8xf32> to vector<2x8x8xf32>
    %49 = vector.extract_strided_slice %26 {offsets = [0, 80], sizes = [16, 8], strides = [1, 1]} : vector<16x96xf32> to vector<16x8xf32>
    %50 = vector.shape_cast %49 : vector<16x8xf32> to vector<2x8x8xf32>
    %51 = vector.extract_strided_slice %26 {offsets = [0, 88], sizes = [16, 8], strides = [1, 1]} : vector<16x96xf32> to vector<16x8xf32>
    %52 = vector.shape_cast %51 : vector<16x8xf32> to vector<2x8x8xf32>
    %53 = tpu.concatenate %46, %48, %50, %52 in 0 : vector<2x8x8xf32>, vector<2x8x8xf32>, vector<2x8x8xf32>, vector<2x8x8xf32> -> vector<8x8x8xf32>
    "tpu.trace_start"() <{level = 10 : i32, message = "znd,zmd->znm"}> : () -> ()
    %cst_12 = arith.constant dense<0.000000e+00> : vector<8x8x8xf32>
    %54 = tpu.matmul %35, %44, %cst_12 {dimension_numbers = #tpu.dot_dimension_numbers<[2], [2], [1], [1], [0, 0, 0, 1, 1, 1], [0], [0]>} : vector<8x8x8xf32>, vector<8x8x8xf32>, vector<8x8x8xf32> -> vector<8x8x8xf32>
    "tpu.trace_stop"() : () -> ()
    %cst_13 = arith.constant dense<0xFF800000> : vector<8x8xf32>
    %55 = vector.multi_reduction <maximumf>, %54, %cst_13 [2] : vector<8x8x8xf32> to vector<8x8xf32>
    %56 = vector.shape_cast %55 : vector<8x8xf32> to vector<8x8x1xf32>
    %57 = vector.broadcast %56 : vector<8x8x1xf32> to vector<8x8x8xf32>
    %58 = arith.subf %54, %57 : vector<8x8x8xf32>
    %59 = math.exp %58 : vector<8x8x8xf32>
    %cst_14 = arith.constant dense<0.000000e+00> : vector<8x8xf32>
    %60 = vector.multi_reduction <add>, %59, %cst_14 [2] : vector<8x8x8xf32> to vector<8x8xf32>
    %61 = vector.shape_cast %60 : vector<8x8xf32> to vector<8x8x1xf32>
    %62 = vector.broadcast %61 : vector<8x8x1xf32> to vector<8x8x8xf32>
    %63 = arith.divf %59, %62 : vector<8x8x8xf32>
    "tpu.trace_start"() <{level = 10 : i32, message = "znm,zmd->znd"}> : () -> ()
    %cst_15 = arith.constant dense<0.000000e+00> : vector<8x8x8xf32>
    %64 = tpu.matmul %63, %53, %cst_15 {dimension_numbers = #tpu.dot_dimension_numbers<[2], [1], [1], [2], [0, 0, 0, 1, 1, 2], [0], [0]>} : vector<8x8x8xf32>, vector<8x8x8xf32>, vector<8x8x8xf32> -> vector<8x8x8xf32>
    "tpu.trace_stop"() : () -> ()
    %c0_16 = arith.constant 0 : index
    %c0_17 = arith.constant 0 : index
    %65 = vector.load %arg5[%c0_16, %c0_17] : memref<32x32xf32, #tpu.memory_space<vmem>>, vector<32x32xf32>
    %66 = vector.extract_strided_slice %64 {offsets = [0, 0, 0], sizes = [2, 8, 8], strides = [1, 1, 1]} : vector<8x8x8xf32> to vector<2x8x8xf32>
    %67 = vector.shape_cast %66 : vector<2x8x8xf32> to vector<16x8xf32>
    %68 = vector.extract_strided_slice %65 {offsets = [0, 0], sizes = [8, 32], strides = [1, 1]} : vector<32x32xf32> to vector<8x32xf32>
    %cst_18 = arith.constant dense<0.000000e+00> : vector<16x32xf32>
    %69 = tpu.matmul %67, %68, %cst_18 {dimension_numbers = #tpu.dot_dimension_numbers<[1], [0], [0], [1], [0, 0, 1, 1], [], []>} : vector<16x8xf32>, vector<8x32xf32>, vector<16x32xf32> -> vector<16x32xf32>
    %70 = vector.extract_strided_slice %64 {offsets = [2, 0, 0], sizes = [2, 8, 8], strides = [1, 1, 1]} : vector<8x8x8xf32> to vector<2x8x8xf32>
    %71 = vector.shape_cast %70 : vector<2x8x8xf32> to vector<16x8xf32>
    %72 = vector.extract_strided_slice %65 {offsets = [8, 0], sizes = [8, 32], strides = [1, 1]} : vector<32x32xf32> to vector<8x32xf32>
    %cst_19 = arith.constant dense<0.000000e+00> : vector<16x32xf32>
    %73 = tpu.matmul %71, %72, %cst_19 {dimension_numbers = #tpu.dot_dimension_numbers<[1], [0], [0], [1], [0, 0, 1, 1], [], []>} : vector<16x8xf32>, vector<8x32xf32>, vector<16x32xf32> -> vector<16x32xf32>
    %74 = arith.addf %69, %73 : vector<16x32xf32>
    %75 = vector.extract_strided_slice %64 {offsets = [4, 0, 0], sizes = [2, 8, 8], strides = [1, 1, 1]} : vector<8x8x8xf32> to vector<2x8x8xf32>
    %76 = vector.shape_cast %75 : vector<2x8x8xf32> to vector<16x8xf32>
    %77 = vector.extract_strided_slice %65 {offsets = [16, 0], sizes = [8, 32], strides = [1, 1]} : vector<32x32xf32> to vector<8x32xf32>
    %cst_20 = arith.constant dense<0.000000e+00> : vector<16x32xf32>
    %78 = tpu.matmul %76, %77, %cst_20 {dimension_numbers = #tpu.dot_dimension_numbers<[1], [0], [0], [1], [0, 0, 1, 1], [], []>} : vector<16x8xf32>, vector<8x32xf32>, vector<16x32xf32> -> vector<16x32xf32>
    %79 = arith.addf %74, %78 : vector<16x32xf32>
    %80 = vector.extract_strided_slice %64 {offsets = [6, 0, 0], sizes = [2, 8, 8], strides = [1, 1, 1]} : vector<8x8x8xf32> to vector<2x8x8xf32>
    %81 = vector.shape_cast %80 : vector<2x8x8xf32> to vector<16x8xf32>
    %82 = vector.extract_strided_slice %65 {offsets = [24, 0], sizes = [8, 32], strides = [1, 1]} : vector<32x32xf32> to vector<8x32xf32>
    %cst_21 = arith.constant dense<0.000000e+00> : vector<16x32xf32>
    %83 = tpu.matmul %81, %82, %cst_21 {dimension_numbers = #tpu.dot_dimension_numbers<[1], [0], [0], [1], [0, 0, 1, 1], [], []>} : vector<16x8xf32>, vector<8x32xf32>, vector<16x32xf32> -> vector<16x32xf32>
    %84 = arith.addf %79, %83 : vector<16x32xf32>
    %c0_22 = arith.constant 0 : index
    %c0_23 = arith.constant 0 : index
    %85 = vector.load %arg6[%c0_22, %c0_23] : memref<1x32xf32, #tpu.memory_space<vmem>>, vector<1x32xf32>
    %86 = vector.broadcast %85 : vector<1x32xf32> to vector<16x32xf32>
    %87 = arith.addf %84, %86 : vector<16x32xf32>
    %88 = arith.addf %0, %87 : vector<16x32xf32>
    %c0_24 = arith.constant 0 : index
    %c0_25 = arith.constant 0 : index
    %89 = vector.load %arg7[%c0_24, %c0_25] : memref<1x32xf32, #tpu.memory_space<vmem>>, vector<1x32xf32>
    %c0_26 = arith.constant 0 : index
    %c0_27 = arith.constant 0 : index
    %90 = vector.load %arg8[%c0_26, %c0_27] : memref<1x32xf32, #tpu.memory_space<vmem>>, vector<1x32xf32>
    %cst_28 = arith.constant dense<0.000000e+00> : vector<16xf32>
    %91 = vector.multi_reduction <add>, %88, %cst_28 [1] : vector<16x32xf32> to vector<16xf32>
    %92 = vector.shape_cast %91 : vector<16xf32> to vector<16x1xf32>
    %cst_29 = arith.constant 3.200000e+01 : f32
    %93 = vector.broadcast %cst_29 : f32 to vector<16x1xf32>
    %94 = arith.divf %92, %93 : vector<16x1xf32>
    %95 = arith.mulf %88, %88 : vector<16x32xf32>
    %cst_30 = arith.constant dense<0.000000e+00> : vector<16xf32>
    %96 = vector.multi_reduction <add>, %95, %cst_30 [1] : vector<16x32xf32> to vector<16xf32>
    %97 = vector.shape_cast %96 : vector<16xf32> to vector<16x1xf32>
    %cst_31 = arith.constant 3.200000e+01 : f32
    %98 = vector.broadcast %cst_31 : f32 to vector<16x1xf32>
    %99 = arith.divf %97, %98 : vector<16x1xf32>
    %100 = arith.mulf %94, %94 : vector<16x1xf32>
    %101 = arith.subf %99, %100 : vector<16x1xf32>
    %cst_32 = arith.constant 9.99999974E-6 : f32
    %102 = vector.broadcast %cst_32 : f32 to vector<16x1xf32>
    %103 = arith.addf %101, %102 : vector<16x1xf32>
    %104 = math.rsqrt %103 : vector<16x1xf32>
    %105 = vector.broadcast %94 : vector<16x1xf32> to vector<16x32xf32>
    %106 = arith.subf %88, %105 : vector<16x32xf32>
    %107 = vector.broadcast %104 : vector<16x1xf32> to vector<16x32xf32>
    %108 = vector.broadcast %89 : vector<1x32xf32> to vector<16x32xf32>
    %109 = arith.mulf %107, %108 : vector<16x32xf32>
    %110 = arith.mulf %106, %109 : vector<16x32xf32>
    %111 = vector.broadcast %90 : vector<1x32xf32> to vector<16x32xf32>
    %112 = arith.addf %110, %111 : vector<16x32xf32>
    %c0_33 = arith.constant 0 : index
    %c0_34 = arith.constant 0 : index
    %113 = vector.load %arg9[%c0_33, %c0_34] : memref<32x128xf32, #tpu.memory_space<vmem>>, vector<32x128xf32>
    %cst_35 = arith.constant dense<0.000000e+00> : vector<16x128xf32>
    %114 = tpu.matmul %112, %113, %cst_35 {dimension_numbers = #tpu.dot_dimension_numbers<[1], [0], [0], [1], [0, 0, 1, 1], [], []>} : vector<16x32xf32>, vector<32x128xf32>, vector<16x128xf32> -> vector<16x128xf32>
    %c0_36 = arith.constant 0 : index
    %c0_37 = arith.constant 0 : index
    %115 = vector.load %arg10[%c0_36, %c0_37] : memref<1x128xf32, #tpu.memory_space<vmem>>, vector<1x128xf32>
    %116 = vector.broadcast %115 : vector<1x128xf32> to vector<16x128xf32>
    %117 = arith.addf %114, %116 : vector<16x128xf32>
    %cst_38 = arith.constant 5.000000e-01 : f32
    %118 = vector.broadcast %cst_38 : f32 to vector<16x128xf32>
    %119 = arith.mulf %118, %117 : vector<16x128xf32>
    %cst_39 = arith.constant 0.707106769 : f32
    %120 = vector.broadcast %cst_39 : f32 to vector<16x128xf32>
    %121 = arith.mulf %117, %120 : vector<16x128xf32>
    %122 = math.absf %121 : vector<16x128xf32>
    %cst_40 = arith.constant 0.327591091 : f32
    %123 = vector.broadcast %cst_40 : f32 to vector<16x128xf32>
    %124 = arith.mulf %123, %122 : vector<16x128xf32>
    %cst_41 = arith.constant 1.000000e+00 : f32
    %125 = vector.broadcast %cst_41 : f32 to vector<16x128xf32>
    %126 = arith.addf %125, %124 : vector<16x128xf32>
    %cst_42 = arith.constant 1.000000e+00 : f32
    %127 = vector.broadcast %cst_42 : f32 to vector<16x128xf32>
    %128 = arith.divf %127, %126 : vector<16x128xf32>
    %cst_43 = arith.constant 1.06140542 : f32
    %129 = vector.broadcast %cst_43 : f32 to vector<16x128xf32>
    %130 = arith.mulf %129, %128 : vector<16x128xf32>
    %cst_44 = arith.constant -1.45315206 : f32
    %131 = vector.broadcast %cst_44 : f32 to vector<16x128xf32>
    %132 = arith.addf %130, %131 : vector<16x128xf32>
    %133 = arith.mulf %132, %128 : vector<16x128xf32>
    %cst_45 = arith.constant 1.42141378 : f32
    %134 = vector.broadcast %cst_45 : f32 to vector<16x128xf32>
    %135 = arith.addf %133, %134 : vector<16x128xf32>
    %136 = arith.mulf %135, %128 : vector<16x128xf32>
    %cst_46 = arith.constant -0.284496725 : f32
    %137 = vector.broadcast %cst_46 : f32 to vector<16x128xf32>
    %138 = arith.addf %136, %137 : vector<16x128xf32>
    %139 = arith.mulf %138, %128 : vector<16x128xf32>
    %cst_47 = arith.constant 0.254829586 : f32
    %140 = vector.broadcast %cst_47 : f32 to vector<16x128xf32>
    %141 = arith.addf %139, %140 : vector<16x128xf32>
    %142 = arith.mulf %141, %128 : vector<16x128xf32>
    %cst_48 = arith.constant 0.000000e+00 : f32
    %143 = vector.broadcast %cst_48 : f32 to vector<16x128xf32>
    %144 = arith.subf %143, %122 : vector<16x128xf32>
    %145 = arith.mulf %144, %122 : vector<16x128xf32>
    %146 = math.exp %145 : vector<16x128xf32>
    %147 = arith.mulf %142, %146 : vector<16x128xf32>
    %cst_49 = arith.constant 1.000000e+00 : f32
    %148 = vector.broadcast %cst_49 : f32 to vector<16x128xf32>
    %149 = arith.subf %148, %147 : vector<16x128xf32>
    %cst_50 = arith.constant 0.000000e+00 : f32
    %150 = vector.broadcast %cst_50 : f32 to vector<16x128xf32>
    %151 = arith.cmpf olt, %121, %150 : vector<16x128xf32>
    %cst_51 = arith.constant 0.000000e+00 : f32
    %152 = vector.broadcast %cst_51 : f32 to vector<16x128xf32>
    %153 = arith.subf %152, %149 : vector<16x128xf32>
    %154 = arith.select %151, %153, %149 : vector<16x128xi1>, vector<16x128xf32>
    %cst_52 = arith.constant 1.000000e+00 : f32
    %155 = vector.broadcast %cst_52 : f32 to vector<16x128xf32>
    %156 = arith.addf %155, %154 : vector<16x128xf32>
    %157 = arith.mulf %119, %156 : vector<16x128xf32>
    %c0_53 = arith.constant 0 : index
    %c0_54 = arith.constant 0 : index
    %158 = vector.load %arg11[%c0_53, %c0_54] : memref<128x32xf32, #tpu.memory_space<vmem>>, vector<128x32xf32>
    %cst_55 = arith.constant dense<0.000000e+00> : vector<16x32xf32>
    %159 = tpu.matmul %157, %158, %cst_55 {dimension_numbers = #tpu.dot_dimension_numbers<[1], [0], [0], [1], [0, 0, 1, 1], [], []>} : vector<16x128xf32>, vector<128x32xf32>, vector<16x32xf32> -> vector<16x32xf32>
    %c0_56 = arith.constant 0 : index
    %c0_57 = arith.constant 0 : index
    %160 = vector.load %arg12[%c0_56, %c0_57] : memref<1x32xf32, #tpu.memory_space<vmem>>, vector<1x32xf32>
    %161 = vector.broadcast %160 : vector<1x32xf32> to vector<16x32xf32>
    %162 = arith.addf %159, %161 : vector<16x32xf32>
    %163 = arith.addf %88, %162 : vector<16x32xf32>
    %c0_58 = arith.constant 0 : index
    %c0_59 = arith.constant 0 : index
    %164 = vector.load %arg13[%c0_58, %c0_59] : memref<16x32xf32, #tpu.memory_space<vmem>>, vector<16x32xf32>
    tpu.vector_store %arg13[%c0_58, %c0_59], %163 {strides = array<i32>} : memref<16x32xf32, #tpu.memory_space<vmem>>, vector<16x32xf32>,
    return
  }
  func.func @transform_0(%arg0: i32) -> (i32, i32) {
    %c0_i32 = arith.constant 0 : i32
    %c0_i32_0 = arith.constant 0 : i32
    %c0_i32_1 = arith.constant 0 : i32
    return %c0_i32, %c0_i32_0 : i32, i32
  }
  func.func @transform_1(%arg0: i32) -> (i32, i32) {
    %c0_i32 = arith.constant 0 : i32
    %c0_i32_0 = arith.constant 0 : i32
    %c0_i32_1 = arith.constant 0 : i32
    return %c0_i32, %c0_i32_0 : i32, i32
  }
  func.func @transform_2(%arg0: i32) -> (i32, i32) {
    %c0_i32 = arith.constant 0 : i32
    %c0_i32_0 = arith.constant 0 : i32
    %c0_i32_1 = arith.constant 0 : i32
    return %c0_i32, %c0_i32_0 : i32, i32
  }
  func.func @transform_3(%arg0: i32) -> (i32, i32) {
    %c0_i32 = arith.constant 0 : i32
    %c0_i32_0 = arith.constant 0 : i32
    %c0_i32_1 = arith.constant 0 : i32
    return %c0_i32, %c0_i32_0 : i32, i32
  }
  func.func @transform_4(%arg0: i32) -> (i32, i32) {
    %c0_i32 = arith.constant 0 : i32
    %c0_i32_0 = arith.constant 0 : i32
    %c0_i32_1 = arith.constant 0 : i32
    return %c0_i32, %c0_i32_0 : i32, i32
  }
  func.func @transform_5(%arg0: i32) -> (i32, i32) {
    %c0_i32 = arith.constant 0 : i32
    %c0_i32_0 = arith.constant 0 : i32
    %c0_i32_1 = arith.constant 0 : i32
    return %c0_i32, %c0_i32_0 : i32, i32
  }
  func.func @transform_6(%arg0: i32) -> (i32, i32) {
    %c0_i32 = arith.constant 0 : i32
    %c0_i32_0 = arith.constant 0 : i32
    %c0_i32_1 = arith.constant 0 : i32
    return %c0_i32, %c0_i32_0 : i32, i32
  }
  func.func @transform_7(%arg0: i32) -> (i32, i32) {
    %c0_i32 = arith.constant 0 : i32
    %c0_i32_0 = arith.constant 0 : i32
    %c0_i32_1 = arith.constant 0 : i32
    return %c0_i32, %c0_i32_0 : i32, i32
  }
  func.func @transform_8(%arg0: i32) -> (i32, i32) {
    %c0_i32 = arith.constant 0 : i32
    %c0_i32_0 = arith.constant 0 : i32
    %c0_i32_1 = arith.constant 0 : i32
    return %c0_i32, %c0_i32_0 : i32, i32
  }
  func.func @transform_9(%arg0: i32) -> (i32, i32) {
    %c0_i32 = arith.constant 0 : i32
    %c0_i32_0 = arith.constant 0 : i32
    %c0_i32_1 = arith.constant 0 : i32
    return %c0_i32, %c0_i32_0 : i32, i32
  }
  func.func @transform_10(%arg0: i32) -> (i32, i32) {
    %c0_i32 = arith.constant 0 : i32
    %c0_i32_0 = arith.constant 0 : i32
    %c0_i32_1 = arith.constant 0 : i32
    return %c0_i32, %c0_i32_0 : i32, i32
  }
  func.func @transform_11(%arg0: i32) -> (i32, i32) {
    %c0_i32 = arith.constant 0 : i32
    %c0_i32_0 = arith.constant 0 : i32
    %c0_i32_1 = arith.constant 0 : i32
    return %c0_i32, %c0_i32_0 : i32, i32
  }
  func.func @transform_12(%arg0: i32) -> (i32, i32) {
    %c0_i32 = arith.constant 0 : i32
    %c0_i32_0 = arith.constant 0 : i32
    %c0_i32_1 = arith.constant 0 : i32
    return %c0_i32, %c0_i32_0 : i32, i32
  }
}

</mosaic_0001>

<bundles_post_ra>
// kernel: tpu_custom_call.1
= control target key start
LH: loop header
LB: loop body
LE: loop exit
PB: predicated region body
PF: predicated region fallthrough
CT: control target
= control target key end

     0   :  { %vm46_vm0 = vcmask 261120   ;;  %s2977_s0 = inlined_call_operand.vmem [shape: f32[16,32], index: 0, kind: input, shape index: {}]   ;;  %s2978_s1 = inlined_call_operand.vmem [shape: f32[1,32], index: 1, kind: input, shape index: {}]   ;;  %s2979_s2 = inlined_call_operand.vmem [shape: f32[1,32], index: 2, kind: input, shape index: {}]   ;;  %s2980_s3 = inlined_call_operand.vmem [shape: f32[32,96], index: 3, kind: input, shape index: {}]   ;;  %s2981_s4 = inlined_call_operand.vmem [shape: f32[32,32], index: 4, kind: input, shape index: {}]   ;;  %s2982_s5 = inlined_call_operand.vmem [shape: f32[1,32], index: 5, kind: input, shape index: {}]   ;;  %s2983_s6 = inlined_call_operand.vmem [shape: f32[1,32], index: 6, kind: input, shape index: {}]   ;;  %s2984_s7 = inlined_call_operand.vmem [shape: f32[1,32], index: 7, kind: input, shape index: {}]   ;;  %s2985_s8 = inlined_call_operand.vmem [shape: f32[32,128], index: 8, kind: input, shape index: {}]   ;;  %s2986_s9 = inlined_call_operand.vmem [shape: f32[1,128], index: 9, kind: input, shape index: {}]   ;;  %s2987_s10 = inlined_call_operand.vmem [shape: f32[128,32], index: 10, kind: input, shape index: {}]   ;;  %s2988_s11 = inlined_call_operand.vmem [shape: f32[1,32], index: 11, kind: input, shape index: {}]   ;;  %s2989_s12 = inlined_call_operand.hbm [shape: f32[16,32], index: 12, kind: output, shape index: {}]  }
   0x1   :  { %v2641_v0 = vld [vmem:[%s2977_s0] sm:$0xff]  ;;  %v2646_v1 = vld [vmem:[%s2977_s0 + $0x8] sm:$0xff] }
   0x2   :  { %17 = vsyncpa [#allocation3], 0  ;;  %v47_v2 = vsel %vm46_vm0, %v2641_v0, 0.0  ;;  %v56_v3 = vmul.f32 %v2641_v0, %v2641_v0  ;;  %v57_v4 = vmul.f32 %v2646_v1, %v2646_v1  ;;  %v50_v6 = vsel %vm46_vm0, %v2646_v1, 0.0  ;;  %v94_v8 = vld [vmem:[%s2980_s3] sm:$0xff]  ;;  %v95_v9 = vld [vmem:[%s2980_s3 + $0x8] sm:$0xff] }
   0x3   :  { %48 = vadd.xlane.f32.xlu0 %v47_v2  ;;  %v96_v10 = vld [vmem:[%s2980_s3 + $0x10] sm:$0xff]  ;;  %v2427_v11 = vpack.c.bf16 %v95_v9, %v94_v8  ;;  %v97_v12 = vld [vmem:[%s2980_s3 + $0x18] sm:$0xff]  ;;  %v2153_v28 = vld [vmem:[%s2978_s1] ss:$0 sm:$0xff]  ;;  %v2563_v40 = vmov 0.0   ;;  %vm2564_vm1 = vmmov 0  }
   0x4   :  { %v58_v5 = vsel %vm46_vm0, %v56_v3, 0.0  ;;  %v61_v7 = vsel %vm46_vm0, %v57_v4, 0.0  ;;  %v2431_v13 = vpack.c.bf16 %v97_v12, %v96_v10  ;;  %v2154_v32 = vld [vmem:[%s2979_s2] ss:$0 sm:$0xff]  ;;  %2286 = vmatprep.subr.mxu1 %v2563_v40  ;;  %2288 = vmatprep.mubr.msk.f32.mxu1 %vm2564_vm1, %v2563_v40  ;;  %s2565_s1 = smov 120   ;;  %s2566_s2 = smov 112  }
   0x5   :  { %59 = vadd.xlane.f32.xlu1 %v58_v5  ;;  %2428 = vmatprep.subr.bf16.mxu0 %v2427_v11  ;;  %s2567_s17 = smov 104   ;;  %s2568_s18 = smov 96   ;;  %vm195_vm2 = vcmask 64512  }
   0x6   :  { %2430 = vmatpush3.bf16.msra.mxu0 %v2427_v11  ;;  %s2569_s19 = smov 64   ;;  %s2570_s22 = smov [#allocation2]  }
   0x7   :  { %51 = vadd.xlane.f32.xlu0 %v50_v6  ;;  %2432 = vmatprep.subr.bf16.mxu0 %v2431_v13  ;;  %s2142_s23 = sshll.u32 %s2570_s22, 4  ;;  %s2143_s23 = int_to_ptr.vmem [resolvable:$true] %s2142_s23 }
   0x8   :  { %s2539_s24 = scalar_lea.vmem %s2143_s23, 256  ;;  %p2544_p1 = scmp.lt.s32.totalorder %s2143_s23, %s2143_s23 }
   0x9   :  { %62 = vadd.xlane.f32.xlu1 %v61_v7  ;;  %p2540_p0 = scmp.ne.s32.totalorder %s2143_s23, %s2539_s24  ;;  %p2545_p2 = scmp.lt.s32.totalorder %s2539_s24, %s2539_s24 }
   0xa   :  { %2434 = vmatpush3.bf16.msra.mxu0 %v2431_v13 }
   0xb   :  { %2281 = vmatprep.subr.mxu0 %v2563_v40  ;;  %p2546_p3 = por %p2545_p2, %p2544_p1 }
   0xd   :  { %p2547_p4 = pnand %p2546_p3, %p2540_p0 }
  0x90   :  { %v49_v14 = vpop.xlane.xlu0 %48 }
  0x91   :  { %v54_v15 = vmul.f32 0.03125, %v49_v14 }
  0x92   :  { %v60_v16 = vpop.xlane.xlu1 %59 }
  0x93   :  { %v66_v17 = vmul.f32 %v54_v15, %v54_v15  ;;  %v64_v18 = vmul.f32 0.03125, %v60_v16  ;;  %v74_v30 = vsub.f32 %v2641_v0, %v54_v15 }
  0x94   :  { %v52_v19 = vpop.xlane.xlu0 %51 }
  0x95   :  { %v68_v20 = vsub.f32 %v64_v18, %v66_v17  ;;  %v55_v21 = vmul.f32 0.03125, %v52_v19 }
  0x96   :  { %v63_v22 = vpop.xlane.xlu1 %62 }
  0x97   :  { %v70_v23 = vadd.f32 1e-05, %v68_v20  ;;  %v67_v24 = vmul.f32 %v55_v21, %v55_v21  ;;  %v65_v25 = vmul.f32 0.03125, %v63_v22  ;;  %v75_v35 = vsub.f32 %v2646_v1, %v55_v21 }
  0x99   :  { %2491 = vrsqrt.f32 %v70_v23  ;;  %v69_v26 = vsub.f32 %v65_v25, %v67_v24 }
  0x9b   :  { %v71_v27 = vadd.f32 1e-05, %v69_v26 }
  0x9d   :  { %2493 = vrsqrt.f32 %v71_v27 }
  0xa3   :  { %v2492_v29 = vpop.eup %2491 }
  0xa4   :  { %v82_v31 = vmul.f32 %v2492_v29, %v2153_v28 }
  0xa6   :  { %v84_v33 = vmul.f32 %v82_v31, %v74_v30 }
  0xa7   :  { %v2494_v34 = vpop.eup %2493 }
  0xa8   :  { %v83_v36 = vmul.f32 %v2494_v34, %v2153_v28  ;;  %v92_v37 = vadd.f32 %v2154_v32, %v84_v33 }
  0xaa   :  { %v85_v38 = vmul.f32 %v83_v36, %v75_v35  ;;  %2278 = vmatprep.mubr.msk.f32.mxu0 %vm46_vm0, %v92_v37 }
  0xac   :  { %v93_v39 = vadd.f32 %v2154_v32, %v85_v38 }
  0xae   :  { %2279 = vmatmul.mubr.msk.f32.vlgmr.msra.gmra.mrb[0].mxu0 %vm46_vm0, %v93_v39 }
  0xaf   :  { %2283 = vmatprep.mubr.msk.f32.mxu0 %vm2564_vm1, %v2563_v40 }
 0x181   :  { %v2686_v41 = vpop.f32.mrb[0].mxu0 }
 0x182   :  { %183 = vrot.lane.b32.xlu1 %v2686_v41, %s2565_s1  ;;  %v2689_v42 = vpop.f32.mrb[1].mxu0 }
 0x183   :  { %181 = vrot.lane.b32.xlu0 %v2689_v42, %s2565_s1 }
 0x186   :  { %185 = vrot.lane.b32.xlu1 %v2689_v42, %s2566_s2 }
 0x187   :  { %189 = vrot.lane.b32.xlu0 %v2689_v42, %s2567_s17 }
 0x18a   :  { %187 = vrot.lane.b32.xlu1 %v2686_v41, %s2566_s2 }
 0x18b   :  { %193 = vrot.lane.b32.xlu0 %v2689_v42, %s2568_s18 }
 0x18e   :  { %191 = vrot.lane.b32.xlu1 %v2686_v41, %s2567_s17 }
 0x192   :  { %270 = vrot.lane.b32.xlu1 %v2686_v41, %s2568_s18 }
 0x1f4   :  { %v2698_v43 = vpop.permute.xlu1 %183 }
 0x1f5   :  { %422 = vrot.lane.b32.xlu1 %v2698_v43, %s2568_s18  ;;  %v2701_v44 = vpop.permute.xlu0 %181 }
 0x1f6   :  { %346 = vrot.lane.b32.xlu0 %v2701_v44, %s2568_s18 }
 0x1f8   :  { %v2704_v45 = vpop.permute.xlu1 %185 }
 0x1f9   :  { %v2706_v46 = vpop.permute.xlu0 %189 }
 0x1fa   :  { %498 = vrot.lane.b32.xlu0 %v2704_v45, %s2568_s18 }
 0x1fc   :  { %v2709_v47 = vpop.permute.xlu1 %187 }
 0x1fd   :  { %574 = vrot.lane.b32.xlu1 %v2709_v47, %s2568_s18  ;;  %v194_v48 = vpop.permute.xlu0 %193 }
 0x1fe   :  { %650 = vrot.lane.b32.xlu0 %v2706_v46, %s2568_s18  ;;  %2282 = vmatpush3.xpose.msk.msra.mxu0 %vm195_vm2, %v194_v48 }
 0x1ff   :  { %2291 = vmatprep.subr.mxu0 %v2563_v40 }
 0x200   :  { %v2715_v49 = vpop.permute.xlu1 %191 }
 0x201   :  { %726 = vrot.lane.b32.xlu1 %v2715_v49, %s2568_s18  ;;  %2284 = vmatmul.mubr.msk.f32.vlgmr.msra.gmra.mrb[2].mxu0 %vm195_vm2, %v2689_v42 }
 0x202   :  { %2293 = vmatprep.mubr.msk.f32.mxu0 %vm2564_vm1, %v2563_v40 }
 0x204   :  { %v271_v50 = vpop.permute.xlu1 %270 }
 0x205   :  { %2287 = vmatpush3.xpose.msk.msra.mxu1 %vm195_vm2, %v271_v50 }
 0x206   :  { %2296 = vmatprep.subr.mxu1 %v2563_v40 }
 0x208   :  { %2289 = vmatmul.mubr.msk.f32.vlgmr.msra.gmra.mrb[0].mxu1 %vm195_vm2, %v2686_v41 }
 0x209   :  { %2298 = vmatprep.mubr.msk.f32.mxu1 %vm2564_vm1, %v2563_v40 }
 0x267   :  { %v423_v51 = vpop.permute.xlu1 %422 }
 0x268   :  { %2297 = vmatpush3.xpose.msk.msra.mxu1 %vm195_vm2, %v423_v51  ;;  %v347_v52 = vpop.permute.xlu0 %346 }
 0x269   :  { %2292 = vmatpush3.xpose.msk.msra.mxu0 %vm195_vm2, %v347_v52  ;;  %2306 = vmatprep.subr.mxu1 %v2563_v40 }
 0x26a   :  { %2301 = vmatprep.subr.mxu0 %v2563_v40 }
 0x26b   :  { %2299 = vmatmul.mubr.msk.f32.vlgmr.msra.gmra.mrb[2].mxu1 %vm195_vm2, %v2698_v43 }
 0x26c   :  { %2294 = vmatmul.mubr.msk.f32.vlgmr.msra.gmra.mrb[4].mxu0 %vm195_vm2, %v2701_v44  ;;  %v499_v53 = vpop.permute.xlu0 %498  ;;  %2308 = vmatprep.mubr.msk.f32.mxu1 %vm2564_vm1, %v2563_v40 }
 0x26d   :  { %2302 = vmatpush3.xpose.msk.msra.mxu0 %vm195_vm2, %v499_v53  ;;  %2303 = vmatprep.mubr.msk.f32.mxu0 %vm2564_vm1, %v2563_v40 }
 0x26e   :  { %2311 = vmatprep.subr.mxu0 %v2563_v40 }
 0x26f   :  { %v575_v54 = vpop.permute.xlu1 %574 }
 0x270   :  { %2304 = vmatmul.mubr.msk.f32.vlgmr.msra.gmra.mrb[6].mxu0 %vm195_vm2, %v2704_v45  ;;  %2307 = vmatpush3.xpose.msk.msra.mxu1 %vm195_vm2, %v575_v54  ;;  %v651_v55 = vpop.permute.xlu0 %650 }
 0x271   :  { %2312 = vmatpush3.xpose.msk.msra.mxu0 %vm195_vm2, %v651_v55  ;;  %2316 = vmatprep.subr.mxu1 %v2563_v40 }
 0x272   :  { %2313 = vmatprep.mubr.msk.f32.mxu0 %vm2564_vm1, %v2563_v40  ;;  %2321 = vmatprep.subr.mxu0 %v2563_v40 }
 0x273   :  { %2309 = vmatmul.mubr.msk.f32.vlgmr.msra.gmra.mrb[4].mxu1 %vm195_vm2, %v2709_v47  ;;  %v727_v56 = vpop.permute.xlu1 %726 }
 0x274   :  { %2314 = vmatmul.mubr.msk.f32.vlgmr.msra.gmra.mrb[8].mxu0 %vm195_vm2, %v2706_v46  ;;  %2317 = vmatpush3.xpose.msk.msra.mxu1 %vm195_vm2, %v727_v56 }
 0x275   :  { %2318 = vmatprep.mubr.msk.f32.mxu1 %vm2564_vm1, %v2563_v40  ;;  %2326 = vmatprep.subr.mxu1 %v2563_v40 }
 0x276   :  { %2323 = vmatprep.mubr.msk.f32.mxu0 %vm2564_vm1, %v2563_v40 }
 0x277   :  { %2319 = vmatmul.mubr.msk.f32.vlgmr.msra.gmra.mrb[6].mxu1 %vm195_vm2, %v2715_v49 }
 0x278   :  { %2328 = vmatprep.mubr.msk.f32.mxu1 %vm2564_vm1, %v2563_v40 }
 0x2d4   :  { %v266_v57 = vpop.f32.mrb[2].mxu0 }
 0x2d5   :  { %v2285_v58 = vpop.f32.mrb[3].mxu0  ;;  %v802_v59 = vsel %vm195_vm2, %v266_v57, -inf }
 0x2d6   :  { %803 = vmax.xlane.f32.xlu0 %v802_v59 }
 0x2db   :  { %v342_v60 = vpop.f32.mrb[0].mxu1 }
 0x2dc   :  { %v2290_v61 = vpop.f32.mrb[1].mxu1  ;;  %v805_v62 = vsel %vm195_vm2, %v342_v60, -inf }
 0x2dd   :  { %806 = vmax.xlane.f32.xlu1 %v805_v62 }
 0x33e   :  { %v494_v63 = vpop.f32.mrb[2].mxu1 }
 0x33f   :  { %v418_v2 = vpop.f32.mrb[4].mxu0  ;;  %v2300_v3 = vpop.f32.mrb[3].mxu1  ;;  %v811_v4 = vsel %vm195_vm2, %v494_v63, -inf }
 0x340   :  { %812 = vmax.xlane.f32.xlu0 %v811_v4  ;;  %v2295_v5 = vpop.f32.mrb[5].mxu0  ;;  %v808_v7 = vsel %vm195_vm2, %v418_v2, -inf }
 0x343   :  { %v2767_v6 = vpop.f32.mrb[6].mxu0 }
 0x344   :  { %809 = vmax.xlane.f32.xlu0 %v808_v7  ;;  %v2305_v8 = vpop.f32.mrb[7].mxu0  ;;  %v814_v13 = vsel %vm195_vm2, %v2767_v6, -inf }
 0x346   :  { %v2770_v9 = vpop.f32.mrb[4].mxu1 }
 0x347   :  { %v2310_v10 = vpop.f32.mrb[5].mxu1  ;;  %v2772_v11 = vpop.f32.mrb[8].mxu0  ;;  %v817_v12 = vsel %vm195_vm2, %v2770_v9, -inf }
 0x348   :  { %818 = vmax.xlane.f32.xlu1 %v817_v12  ;;  %815 = vmax.xlane.f32.xlu0 %v814_v13  ;;  %v2315_v14 = vpop.f32.mrb[9].mxu0  ;;  %v820_v18 = vsel %vm195_vm2, %v2772_v11, -inf }
 0x34a   :  { %v798_v15 = vpop.f32.mrb[6].mxu1 }
 0x34b   :  { %v2320_v16 = vpop.f32.mrb[7].mxu1  ;;  %v823_v17 = vsel %vm195_vm2, %v798_v15, -inf }
 0x34c   :  { %824 = vmax.xlane.f32.xlu1 %v823_v17  ;;  %821 = vmax.xlane.f32.xlu0 %v820_v18 }
 0x35d   :  { %966 = vrot.lane.b32.xlu1 %v2686_v41, %s2569_s19 }
 0x362   :  { %890 = vrot.lane.b32.xlu0 %v2689_v42, %s2569_s19 }
 0x363   :  { %v804_v19 = vpop.xlane.xlu0 %803 }
 0x364   :  { %v826_v20 = vsub.f32 %v266_v57, %v804_v19 }
 0x366   :  { %v834_v23 = vmul.f32 1.442695, %v826_v20 }
 0x368   :  { %2495 = vpow2.f32 %v834_v23 }
 0x36a   :  { %v807_v21 = vpop.xlane.xlu1 %806 }
 0x36b   :  { %v827_v22 = vsub.f32 %v342_v60, %v807_v21 }
 0x36d   :  { %v836_v24 = vmul.f32 1.442695, %v827_v22 }
 0x36f   :  { %2497 = vpow2.f32 %v836_v24 }
 0x372   :  { %v2496_v25 = vpop.eup %2495 }
 0x373   :  { %v850_v28 = vsel %vm195_vm2, %v2496_v25, 0.0 }
 0x379   :  { %v2498_v26 = vpop.eup %2497 }
 0x37a   :  { %v853_v27 = vsel %vm195_vm2, %v2498_v26, 0.0 }
 0x381   :  { %854 = vadd.xlane.f32.xlu1 %v853_v27  ;;  %851 = vadd.xlane.f32.xlu0 %v850_v28 }
 0x3cd   :  { %v813_v29 = vpop.xlane.xlu0 %812 }
 0x3ce   :  { %v829_v30 = vsub.f32 %v494_v63, %v813_v29 }
 0x3d0   :  { %v840_v31 = vmul.f32 1.442695, %v829_v30  ;;  %v1499_v30 = vld [vmem:[%s2981_s4 + $0x8] sm:$0xff] }
 0x3d1   :  { %v810_v32 = vpop.xlane.xlu0 %809 }
 0x3d2   :  { %2499 = vpow2.f32 %v840_v31  ;;  %v828_v33 = vsub.f32 %v418_v2, %v810_v32  ;;  %v1498_v31 = vld [vmem:[%s2981_s4] sm:$0xff] }
 0x3d4   :  { %v838_v34 = vmul.f32 1.442695, %v828_v33 }
 0x3d5   :  { %v819_v35 = vpop.xlane.xlu1 %818  ;;  %v816_v36 = vpop.xlane.xlu0 %815 }
 0x3d6   :  { %2501 = vpow2.f32 %v838_v34  ;;  %v830_v52 = vsub.f32 %v2767_v6, %v816_v36  ;;  %v831_v53 = vsub.f32 %v2770_v9, %v819_v35 }
 0x3d8   :  { %v842_v54 = vmul.f32 1.442695, %v830_v52  ;;  %v844_v56 = vmul.f32 1.442695, %v831_v53 }
 0x3d9   :  { %v825_v37 = vpop.xlane.xlu1 %824  ;;  %v822_v38 = vpop.xlane.xlu0 %821 }
 0x3da   :  { %v833_v55 = vsub.f32 %v798_v15, %v825_v37  ;;  %2503 = vpow2.f32 %v842_v54 }
 0x3db   :  { %2505 = vpow2.f32 %v844_v56  ;;  %v2189_v56 = vld [vmem:[%s2982_s5] ss:$0 sm:$0xff] }
 0x3dc   :  { %v2787_v39 = vpop.eup %2499  ;;  %v848_v57 = vmul.f32 1.442695, %v833_v55 }
 0x3dd   :  { %v967_v41 = vpop.permute.xlu1 %966  ;;  %v891_v42 = vpop.permute.xlu0 %890  ;;  %v859_v48 = vsel %vm195_vm2, %v2787_v39, 0.0 }
 0x3de   :  { %2327 = vmatpush3.msra.mxu1 %v967_v41  ;;  %860 = vadd.xlane.f32.xlu1 %v859_v48  ;;  %2507 = vpow2.f32 %v848_v57  ;;  %v1501_v41 = vld [vmem:[%s2981_s4 + $0x18] sm:$0xff] }
 0x3df   :  { %2322 = vmatpush3.msra.mxu0 %v891_v42  ;;  %2336 = vmatprep.subr.mxu1 %v2563_v40 }
 0x3e0   :  { %v2792_v50 = vpop.eup %2501  ;;  %2331 = vmatprep.subr.mxu0 %v2563_v40 }
 0x3e1   :  { %v856_v51 = vsel %vm195_vm2, %v2792_v50, 0.0 }
 0x3e2   :  { %857 = vadd.xlane.f32.xlu0 %v856_v51 }
 0x3ef   :  { %1118 = vrot.lane.b32.xlu1 %v2698_v43, %s2569_s19  ;;  %v832_v43 = vsub.f32 %v2772_v11, %v822_v38 }
 0x3f3   :  { %1194 = vrot.lane.b32.xlu1 %v2704_v45, %s2569_s19  ;;  %v846_v45 = vmul.f32 1.442695, %v832_v43 }
 0x3f7   :  { %1270 = vrot.lane.b32.xlu1 %v2709_v47, %s2569_s19 }
 0x3f8   :  { %1042 = vrot.lane.b32.xlu0 %v2701_v44, %s2569_s19  ;;  %v2504_v44 = vpop.eup %2503 }
 0x3f9   :  { %v2506_v47 = vpop.eup %2505  ;;  %v862_v60 = vsel %vm195_vm2, %v2504_v44, 0.0 }
 0x3fa   :  { %v2809_v61 = vpop.eup %2507  ;;  %v865_v3 = vsel %vm195_vm2, %v2506_v47, 0.0 }
 0x3fb   :  { %v871_v4 = vsel %vm195_vm2, %v2809_v61, 0.0 }
 0x40e   :  { %v855_v58 = vpop.xlane.xlu1 %854  ;;  %v852_v59 = vpop.xlane.xlu0 %851 }
 0x40f   :  { %2509 = vrcp.f32 %v855_v58 }
 0x410   :  { %2511 = vrcp.f32 %v852_v59 }
 0x411   :  { %2513 = vpow2.f32 %v846_v45 }
 0x417   :  { %863 = vadd.xlane.f32.xlu0 %v862_v60 }
 0x419   :  { %v2510_v62 = vpop.eup %2509 }
 0x41a   :  { %v2512_v63 = vpop.eup %2511  ;;  %v877_v2 = vmul.f32 %v2510_v62, %v2498_v26 }
 0x41b   :  { %v2514_v5 = vpop.eup %2513  ;;  %v875_v6 = vmul.f32 %v2512_v63, %v2496_v25  ;;  %866 = vadd.xlane.f32.xlu1 %v865_v3  ;;  %872 = vadd.xlane.f32.xlu0 %v871_v4  ;;  %v1889_v63 = vld [vmem:[%s2985_s8] sm:$0xff]  ;;  %v1891_v3 = vld [vmem:[%s2985_s8 + $0x10] sm:$0xff] }
 0x41c   :  { %2329 = vmatmul.mubr.msk.f32.vlgmr.msra.gmra.mrb[8].mxu1 %vm195_vm2, %v877_v2  ;;  %v868_v7 = vsel %vm195_vm2, %v2514_v5, 0.0  ;;  %v1890_v2 = vld [vmem:[%s2985_s8 + $0x8] sm:$0xff] }
 0x41d   :  { %2324 = vmatmul.mubr.msk.f32.vlgmr.msra.gmra.mrb[10].mxu0 %vm195_vm2, %v875_v6  ;;  %2338 = vmatprep.mubr.msk.f32.mxu1 %vm2564_vm1, %v2563_v40  ;;  %v2435_v4 = vpack.c.bf16 %v1890_v2, %v1889_v63 }
 0x41e   :  { %2333 = vmatprep.mubr.msk.f32.mxu0 %vm2564_vm1, %v2563_v40 }
 0x41f   :  { %869 = vadd.xlane.f32.xlu1 %v868_v7 }
 0x430   :  { %1422 = vrot.lane.b32.xlu1 %v2715_v49, %s2569_s19 }
 0x431   :  { %1346 = vrot.lane.b32.xlu0 %v2706_v46, %s2569_s19 }
 0x46b   :  { %v861_v8 = vpop.xlane.xlu1 %860 }
 0x46c   :  { %2515 = vrcp.f32 %v861_v8 }
 0x46f   :  { %v1119_v9 = vpop.permute.xlu1 %1118  ;;  %v858_v10 = vpop.xlane.xlu0 %857 }
 0x470   :  { %2517 = vrcp.f32 %v858_v10  ;;  %2337 = vmatpush3.msra.mxu1 %v1119_v9 }
 0x471   :  { %2346 = vmatprep.subr.mxu1 %v2563_v40 }
 0x473   :  { %v1195_v11 = vpop.permute.xlu1 %1194  ;;  %v1043_v12 = vpop.permute.xlu0 %1042 }
 0x474   :  { %2332 = vmatpush3.msra.mxu0 %v1043_v12 }
 0x475   :  { %2341 = vmatprep.subr.mxu0 %v2563_v40 }
 0x476   :  { %v2516_v13 = vpop.eup %2515 }
 0x477   :  { %v881_v14 = vmul.f32 %v2516_v13, %v2787_v39  ;;  %v1271_v49 = vpop.permute.xlu1 %1270  ;;  %v1500_v39 = vld [vmem:[%s2981_s4 + $0x10] sm:$0xff] }
 0x479   :  { %2339 = vmatmul.mubr.msk.f32.vlgmr.msra.gmra.mrb[10].mxu1 %vm195_vm2, %v881_v14 }
 0x47a   :  { %v2518_v46 = vpop.eup %2517  ;;  %2347 = vmatpush3.msra.mxu1 %v1271_v49  ;;  %2348 = vmatprep.mubr.msk.f32.mxu1 %vm2564_vm1, %v2563_v40 }
 0x47b   :  { %v879_v15 = vmul.f32 %v2518_v46, %v2792_v50  ;;  %2356 = vmatprep.subr.mxu1 %v2563_v40 }
 0x47d   :  { %2334 = vmatmul.mubr.msk.f32.vlgmr.msra.gmra.mrb[12].mxu0 %vm195_vm2, %v879_v15 }
 0x47e   :  { %2342 = vmatpush3.msra.mxu0 %v1195_v11  ;;  %2343 = vmatprep.mubr.msk.f32.mxu0 %vm2564_vm1, %v2563_v40 }
 0x47f   :  { %2351 = vmatprep.subr.mxu0 %v2563_v40 }
 0x4a4   :  { %v864_v16 = vpop.xlane.xlu0 %863 }
 0x4a5   :  { %2519 = vrcp.f32 %v864_v16 }
 0x4a8   :  { %v867_v17 = vpop.xlane.xlu1 %866  ;;  %v873_v18 = vpop.xlane.xlu0 %872 }
 0x4a9   :  { %2521 = vrcp.f32 %v867_v17 }
 0x4aa   :  { %2523 = vrcp.f32 %v873_v18 }
 0x4ac   :  { %v870_v19 = vpop.xlane.xlu1 %869  ;;  %v1347_v22 = vpop.permute.xlu0 %1346 }
 0x4ad   :  { %2525 = vrcp.f32 %v870_v19  ;;  %v2190_v19 = vld [vmem:[%s2983_s6] ss:$0 sm:$0xff] }
 0x4af   :  { %v2520_v20 = vpop.eup %2519 }
 0x4b0   :  { %v883_v21 = vmul.f32 %v2520_v20, %v2504_v44  ;;  %v1423_v26 = vpop.permute.xlu1 %1422 }
 0x4b2   :  { %2344 = vmatmul.mubr.msk.f32.vlgmr.msra.gmra.mrb[14].mxu0 %vm195_vm2, %v883_v21 }
 0x4b3   :  { %v2522_v23 = vpop.eup %2521  ;;  %2352 = vmatpush3.msra.mxu0 %v1347_v22  ;;  %2353 = vmatprep.mubr.msk.f32.mxu0 %vm2564_vm1, %v2563_v40 }
 0x4b4   :  { %v885_v24 = vmul.f32 %v2522_v23, %v2506_v47  ;;  %v2524_v25 = vpop.eup %2523  ;;  %2361 = vmatprep.subr.mxu0 %v1499_v30  ;;  %v2191_v23 = vld [vmem:[%s2984_s7] ss:$0 sm:$0xff] }
 0x4b5   :  { %v889_v28 = vmul.f32 %v2524_v25, %v2809_v61 }
 0x4b6   :  { %2349 = vmatmul.mubr.msk.f32.vlgmr.msra.gmra.mrb[12].mxu1 %vm195_vm2, %v885_v24 }
 0x4b7   :  { %v2526_v27 = vpop.eup %2525  ;;  %2357 = vmatpush3.msra.mxu1 %v1423_v26  ;;  %2358 = vmatprep.mubr.msk.f32.mxu1 %vm2564_vm1, %v2563_v40 }
 0x4b8   :  { %v887_v29 = vmul.f32 %v2526_v27, %v2514_v5  ;;  %v1892_v5 = vld [vmem:[%s2985_s8 + $0x18] sm:$0xff] }
 0x4b9   :  { %v2439_v6 = vpack.c.bf16 %v1892_v5, %v1891_v3 }
 0x4ba   :  { %2354 = vmatmul.mubr.msk.f32.vlgmr.msra.gmra.mrb[16].mxu0 %vm195_vm2, %v887_v29  ;;  %2359 = vmatmul.mubr.msk.f32.vlgmr.msra.gmra.mrb[14].mxu1 %vm195_vm2, %v889_v28 }
 0x4bb   :  { %2362 = vmatpush3.msra.mxu0 %v1499_v30 }
 0x4bc   :  { %2366 = vmatprep.subr.mxu0 %v1498_v31 }
 0x4ef   :  { %v1038_v32 = vpop.f32.mrb[8].mxu1 }
 0x4f0   :  { %v962_v40 = vpop.f32.mrb[10].mxu0  ;;  %v2330_v33 = vpop.f32.mrb[9].mxu1 }
 0x4f1   :  { %v2325_v34 = vpop.f32.mrb[11].mxu0  ;;  %v2037_v33 = vld [vmem:[%s2987_s10 + $0x10] sm:$0xff] }
 0x4f2   :  { %v2038_v34 = vld [vmem:[%s2987_s10 + $0x18] sm:$0xff] }
 0x54c   :  { %v1190_v35 = vpop.f32.mrb[10].mxu1 }
 0x54d   :  { %v2340_v36 = vpop.f32.mrb[11].mxu1 }
 0x54e   :  { %v2039_v36 = vld [vmem:[%s2987_s10 + $0x20] sm:$0xff] }
 0x550   :  { %v1114_v37 = vpop.f32.mrb[12].mxu0 }
 0x551   :  { %v2335_v38 = vpop.f32.mrb[13].mxu0  ;;  %2363 = vmatprep.mubr.msk.f32.mxu0 %vm195_vm2, %v1114_v37  ;;  %v2040_v37 = vld [vmem:[%s2987_s10 + $0x28] sm:$0xff] }
 0x552   :  { %2364 = vmatmul.mubr.msk.f32.vlgmr.msra.gmra.mrb[18].mxu0 %vm195_vm2, %v1190_v35  ;;  %v2447_v35 = vpack.c.bf16 %v2038_v34, %v2037_v33  ;;  %v2451_v38 = vpack.c.bf16 %v2040_v37, %v2039_v36 }
 0x553   :  { %2368 = vmatprep.mubr.msk.f32.mxu0 %vm195_vm2, %v962_v40  ;;  %2367 = vmatpush3.msra.mxu0 %v1498_v31  ;;  %v2035_v31 = vld [vmem:[%s2987_s10] sm:$0xff] }
 0x554   :  { %2371 = vmatprep.subr.mxu0 %v1500_v39 }
 0x55a   :  { %2369 = vmatmul.mubr.msk.f32.vlgmr.msra.gmra.mrb[18].mxu0 %vm195_vm2, %v1038_v32  ;;  %v2036_v32 = vld [vmem:[%s2987_s10 + $0x8] sm:$0xff] }
 0x55b   :  { %2372 = vmatpush3.msra.mxu0 %v1500_v39  ;;  %v2443_v40 = vpack.c.bf16 %v2036_v32, %v2035_v31  ;;  %v2041_v39 = vld [vmem:[%s2987_s10 + $0x30] sm:$0xff] }
 0x55c   :  { %2376 = vmatprep.subr.mxu0 %v1501_v41 }
 0x55d   :  { %2444 = vmatprep.subr.bf16.mxu1 %v2443_v40 }
 0x55e   :  { %2446 = vmatpush3.bf16.msra.mxu1 %v2443_v40 }
 0x55f   :  { %2448 = vmatprep.subr.bf16.mxu1 %v2447_v35 }
 0x562   :  { %2450 = vmatpush3.bf16.msra.mxu1 %v2447_v35 }
 0x563   :  { %2452 = vmatprep.subr.bf16.mxu1 %v2451_v38 }
 0x566   :  { %2454 = vmatpush3.bf16.msra.mxu1 %v2451_v38 }
 0x585   :  { %v1266_v42 = vpop.f32.mrb[14].mxu0 }
 0x586   :  { %v2345_v48 = vpop.f32.mrb[15].mxu0  ;;  %2373 = vmatprep.mubr.msk.f32.mxu0 %vm195_vm2, %v1266_v42 }
 0x587   :  { %v2043_v48 = vld [vmem:[%s2987_s10 + $0x40] sm:$0xff] }
 0x589   :  { %v1342_v50 = vpop.f32.mrb[12].mxu1 }
 0x58a   :  { %v2350_v51 = vpop.f32.mrb[13].mxu1  ;;  %2374 = vmatmul.mubr.msk.f32.vlgmr.msra.gmra.mrb[18].mxu0 %vm195_vm2, %v1342_v50  ;;  %v2044_v50 = vld [vmem:[%s2987_s10 + $0x48] sm:$0xff] }
 0x58b   :  { %2377 = vmatpush3.msra.mxu0 %v1501_v41  ;;  %v2042_v41 = vld [vmem:[%s2987_s10 + $0x38] sm:$0xff]  ;;  %v2459_v51 = vpack.c.bf16 %v2044_v50, %v2043_v48 }
 0x58c   :  { %2436 = vmatprep.subr.bf16.mxu0 %v2435_v4  ;;  %v2455_v42 = vpack.c.bf16 %v2042_v41, %v2041_v39 }
 0x58d   :  { %v1418_v52 = vpop.f32.mrb[16].mxu0  ;;  %v1494_v53 = vpop.f32.mrb[14].mxu1 }
 0x58e   :  { %v2355_v54 = vpop.f32.mrb[17].mxu0  ;;  %v2360_v55 = vpop.f32.mrb[15].mxu1  ;;  %2378 = vmatprep.mubr.msk.f32.mxu0 %vm195_vm2, %v1418_v52  ;;  %2456 = vmatprep.subr.bf16.mxu1 %v2455_v42  ;;  %v2045_v52 = vld [vmem:[%s2987_s10 + $0x50] sm:$0xff] }
 0x58f   :  { %2458 = vmatpush3.bf16.msra.mxu1 %v2455_v42  ;;  %v2047_v55 = vld [vmem:[%s2987_s10 + $0x60] sm:$0xff] }
 0x590   :  { %2460 = vmatprep.subr.bf16.mxu1 %v2459_v51 }
 0x592   :  { %2379 = vmatmul.mubr.msk.f32.vlgmr.msra.gmra.mrb[18].mxu0 %vm195_vm2, %v1494_v53  ;;  %v2046_v53 = vld [vmem:[%s2987_s10 + $0x58] sm:$0xff] }
 0x593   :  { %2438 = vmatpush3.bf16.msra.mxu0 %v2435_v4  ;;  %2462 = vmatpush3.bf16.msra.mxu1 %v2459_v51  ;;  %v2463_v54 = vpack.c.bf16 %v2046_v53, %v2045_v52 }
 0x594   :  { %2440 = vmatprep.subr.bf16.mxu0 %v2439_v6 }
 0x595   :  { %2464 = vmatprep.subr.bf16.mxu1 %v2463_v54 }
 0x597   :  { %2442 = vmatpush3.bf16.msra.mxu0 %v2439_v6  ;;  %2466 = vmatpush3.bf16.msra.mxu1 %v2463_v54  ;;  %v2195_v54 = vld [vmem:[%s2988_s11] ss:$0 sm:$0xff] }
 0x665   :  { %v2380_v57 = vpop.f32.mrb[18].mxu0 }
 0x666   :  { %v1838_v43 = vadd.f32 %v2380_v57, %v2189_v56  ;;  %v1819_v45 = vpop.f32.mrb[19].mxu0 }
 0x667   :  { %v1837_v58 = vadd.f32 %v2189_v56, %v1819_v45  ;;  %v2048_v56 = vld [vmem:[%s2987_s10 + $0x68] sm:$0xff]  ;;  %v2050_v45 = vld [vmem:[%s2987_s10 + $0x78] sm:$0xff] }
 0x668   :  { %v2870_v59 = vadd.f32 %v1838_v43, %v2646_v1  ;;  %v2467_v57 = vpack.c.bf16 %v2048_v56, %v2047_v55  ;;  %v2049_v43 = vld [vmem:[%s2987_s10 + $0x70] sm:$0xff] }
 0x669   :  { %v2873_v44 = vadd.f32 %v1837_v58, %v2641_v0  ;;  %v2471_v58 = vpack.c.bf16 %v2050_v45, %v2049_v43 }
 0x66a   :  { %v1846_v47 = vsel %vm46_vm0, %v2870_v59, 0.0  ;;  %v1852_v1 = vmul.f32 %v2870_v59, %v2870_v59  ;;  %2468 = vmatprep.subr.bf16.mxu1 %v2467_v57 }
 0x66b   :  { %1847 = vadd.xlane.f32.xlu1 %v1846_v47  ;;  %v1843_v60 = vsel %vm46_vm0, %v2873_v44, 0.0  ;;  %v1851_v61 = vmul.f32 %v2873_v44, %v2873_v44  ;;  %2470 = vmatpush3.bf16.msra.mxu1 %v2467_v57  ;;  %v2192_v47 = vld [vmem:[%s2986_s9] ss:$0 sm:$0xff] }
 0x66c   :  { %1844 = vadd.xlane.f32.xlu0 %v1843_v60  ;;  %v1856_v0 = vsel %vm46_vm0, %v1852_v1, 0.0  ;;  %2472 = vmatprep.subr.bf16.mxu1 %v2471_v58 }
 0x66d   :  { %v1853_v62 = vsel %vm46_vm0, %v1851_v61, 0.0 }
 0x66f   :  { %2474 = vmatpush3.bf16.msra.mxu1 %v2471_v58 }
 0x670   :  { %1854 = vadd.xlane.f32.xlu0 %v1853_v62 }
 0x674   :  { %1857 = vadd.xlane.f32.xlu0 %v1856_v0 }
 0x6f8   :  { %v1848_v9 = vpop.xlane.xlu1 %1847 }
 0x6f9   :  { %v1845_v7 = vpop.xlane.xlu0 %1844  ;;  %v1850_v11 = vmul.f32 0.03125, %v1848_v9 }
 0x6fa   :  { %v1849_v8 = vmul.f32 0.03125, %v1845_v7 }
 0x6fb   :  { %v1862_v46 = vmul.f32 %v1850_v11, %v1850_v11  ;;  %v1870_v26 = vsub.f32 %v2870_v59, %v1850_v11 }
 0x6fc   :  { %v1861_v12 = vmul.f32 %v1849_v8, %v1849_v8  ;;  %v1869_v21 = vsub.f32 %v2873_v44, %v1849_v8 }
 0x6fd   :  { %v1855_v10 = vpop.xlane.xlu0 %1854 }
 0x6fe   :  { %v1859_v13 = vmul.f32 0.03125, %v1855_v10 }
 0x700   :  { %v1863_v14 = vsub.f32 %v1859_v13, %v1861_v12 }
 0x701   :  { %v1858_v49 = vpop.xlane.xlu0 %1857 }
 0x702   :  { %v1865_v15 = vadd.f32 1e-05, %v1863_v14  ;;  %v1860_v16 = vmul.f32 0.03125, %v1858_v49 }
 0x704   :  { %2527 = vrsqrt.f32 %v1865_v15  ;;  %v1864_v17 = vsub.f32 %v1860_v16, %v1862_v46 }
 0x706   :  { %v1866_v18 = vadd.f32 1e-05, %v1864_v17 }
 0x708   :  { %2529 = vrsqrt.f32 %v1866_v18 }
 0x70e   :  { %v2528_v20 = vpop.eup %2527 }
 0x70f   :  { %v1877_v22 = vmul.f32 %v2528_v20, %v2190_v19 }
 0x711   :  { %v1879_v24 = vmul.f32 %v1877_v22, %v1869_v21 }
 0x712   :  { %v2530_v25 = vpop.eup %2529 }
 0x713   :  { %v1878_v27 = vmul.f32 %v2530_v25, %v2190_v19  ;;  %v1887_v28 = vadd.f32 %v2191_v23, %v1879_v24 }
 0x715   :  { %v1880_v29 = vmul.f32 %v1878_v27, %v1870_v26  ;;  %2389 = vmatprep.mubr.msk.f32.mxu0 %vm46_vm0, %v1887_v28 }
 0x717   :  { %v1888_v30 = vadd.f32 %v2191_v23, %v1880_v29 }
 0x719   :  { %2390 = vmatmul.mubr.msk.f32.vlgmr.msra.gmra.mrb[20].mxu0 %vm46_vm0, %v1888_v30 }
 0x7ec   :  { %v2391_v60 = vpop.f32.mrb[20].mxu0 }
 0x7ed   :  { %v1978_v61 = vadd.f32 %v2391_v60, %v2192_v47  ;;  %v1972_v62 = vpop.f32.mrb[21].mxu0 }
 0x7ee   :  { %v1973_v1 = vadd.f32 %v2192_v47, %v1972_v62 }
 0x7ef   :  { %v1984_v0 = vmul.f32 0.70710677, %v1978_v61  ;;  %v1982_v51 = vmul.f32 0.5, %v1978_v61 }
 0x7f0   :  { %v1983_v63 = vmul.f32 0.70710677, %v1973_v1  ;;  %v1981_v48 = vmul.f32 0.5, %v1973_v1 }
 0x7f1   :  { %v1986_v2 = vand.u32 2147483647, %v1984_v0  ;;  %vm2026_vm3 = vcmp.lt.f32.partialorder %v1984_v0, 0.0 }
 0x7f2   :  { %v1985_v3 = vand.u32 2147483647, %v1983_v63  ;;  %vm2025_vm4 = vcmp.lt.f32.partialorder %v1983_v63, 0.0 }
 0x7f3   :  { %v1988_v4 = vmul.f32 0.3275911, %v1986_v2  ;;  %v2014_v8 = vsub.f32 0.0, %v1986_v2 }
 0x7f4   :  { %v1987_v5 = vmul.f32 0.3275911, %v1985_v3  ;;  %v2013_v9 = vsub.f32 0.0, %v1985_v3 }
 0x7f5   :  { %v1990_v6 = vadd.f32 1.0, %v1988_v4  ;;  %v2016_v11 = vmul.f32 %v2014_v8, %v1986_v2 }
 0x7f6   :  { %v1989_v7 = vadd.f32 1.0, %v1987_v5  ;;  %v2015_v14 = vmul.f32 %v2013_v9, %v1985_v3 }
 0x7f7   :  { %2531 = vrcp.f32 %v1990_v6  ;;  %v2019_v15 = vmul.f32 1.442695, %v2016_v11 }
 0x7f8   :  { %2533 = vrcp.f32 %v1989_v7  ;;  %v2017_v18 = vmul.f32 1.442695, %v2015_v14 }
 0x7f9   :  { %2535 = vpow2.f32 %v2019_v15 }
 0x7fa   :  { %2537 = vpow2.f32 %v2017_v18 }
 0x801   :  { %v2532_v10 = vpop.eup %2531 }
 0x802   :  { %v2534_v12 = vpop.eup %2533  ;;  %v1996_v13 = vmul.f32 1.0614054, %v2532_v10 }
 0x803   :  { %v1995_v49 = vmul.f32 1.0614054, %v2534_v12  ;;  %v2536_v31 = vpop.eup %2535 }
 0x804   :  { %v1998_v46 = vadd.f32 -1.4531521, %v1996_v13  ;;  %v2538_v40 = vpop.eup %2537 }
 0x805   :  { %v1997_v16 = vadd.f32 -1.4531521, %v1995_v49 }
 0x806   :  { %v2000_v17 = vmul.f32 %v2532_v10, %v1998_v46 }
 0x807   :  { %v1999_v19 = vmul.f32 %v2534_v12, %v1997_v16 }
 0x808   :  { %v2002_v20 = vadd.f32 1.4214138, %v2000_v17 }
 0x809   :  { %v2001_v21 = vadd.f32 1.4214138, %v1999_v19 }
 0x80a   :  { %v2004_v22 = vmul.f32 %v2532_v10, %v2002_v20 }
 0x80b   :  { %v2003_v23 = vmul.f32 %v2534_v12, %v2001_v21 }
 0x80c   :  { %v2006_v24 = vadd.f32 -0.28449672, %v2004_v22 }
 0x80d   :  { %v2005_v25 = vadd.f32 -0.28449672, %v2003_v23 }
 0x80e   :  { %v2008_v26 = vmul.f32 %v2532_v10, %v2006_v24 }
 0x80f   :  { %v2007_v27 = vmul.f32 %v2534_v12, %v2005_v25 }
 0x810   :  { %v2010_v28 = vadd.f32 0.2548296, %v2008_v26 }
 0x811   :  { %v2009_v29 = vadd.f32 0.2548296, %v2007_v27 }
 0x812   :  { %v2012_v30 = vmul.f32 %v2532_v10, %v2010_v28 }
 0x813   :  { %v2011_v32 = vmul.f32 %v2534_v12, %v2009_v29 }
 0x814   :  { %v2022_v33 = vmul.f32 %v2536_v31, %v2012_v30 }
 0x815   :  { %v2021_v34 = vmul.f32 %v2538_v40, %v2011_v32 }
 0x816   :  { %v2024_v35 = vsub.f32 1.0, %v2022_v33 }
 0x817   :  { %v2023_v36 = vsub.f32 1.0, %v2021_v34 }
 0x818   :  { %v2028_v37 = vsub.f32 0.0, %v2024_v35 }
 0x819   :  { %v2027_v38 = vsub.f32 0.0, %v2023_v36 }
 0x81a   :  { %v2030_v39 = vsel %vm2026_vm3, %v2028_v37, %v2024_v35 }
 0x81b   :  { %v2032_v41 = vadd.f32 1.0, %v2030_v39  ;;  %v2029_v42 = vsel %vm2025_vm4, %v2027_v38, %v2023_v36 }
 0x81c   :  { %v2031_v50 = vadd.f32 1.0, %v2029_v42 }
 0x81d   :  { %v2034_v53 = vmul.f32 %v2032_v41, %v1982_v51 }
 0x81e   :  { %v2033_v52 = vmul.f32 %v2031_v50, %v1981_v48 }
 0x820   :  { %2424 = vmatprep.mubr.f32.mxu1 %v2033_v52 }
 0x821   :  { %2425 = vmatmul.mubr.f32.vlgmr.msra.gmra.mrb[16].mxu1 %v2034_v53 }
 0x8f4   :  { %v2426_v55 = vpop.f32.mrb[16].mxu1 }
 0x8f5   :  { %v2130_v56 = vadd.f32 %v2426_v55, %v2195_v54  ;;  %v2124_v57 = vpop.f32.mrb[17].mxu1 }
 0x8f6   :  { %v2125_v43 = vadd.f32 %v2195_v54, %v2124_v57 }
 0x8f7   :  { %v2134_v45 = vadd.f32 %v2130_v56, %v2870_v59 }
 0x8f8   :  { %v2133_v58 = vadd.f32 %v2125_v43, %v2873_v44 }
 0x8f9   :  { %2136 = vst.msk [vmem:[#allocation2 + $0x8] sm:$0xff] %vm46_vm0, %v2134_v45 }
 0x8fa   :  { %2135 = vst.msk [vmem:[#allocation2] sm:$0xff] %vm46_vm0, %v2133_v58 }
 0x8fb   :  { %2550 = shalt.err (!%p2547_p4)
}
 0x8fc   :  { %s2551_s25 = scalar_lea.hbm %s2989_s12, 256 }
 0x8fd   :  { %p2552_p5 = scmp.ne.s32.totalorder %s2989_s12, %s2551_s25  ;;  %p2555_p6 = scmp.lt.u32.totalorder %s2551_s25, %s2989_s12 }
 0x8ff   :  { %p2557_p7 = pnand %p2555_p6, %p2552_p5 }
 0x901   :  { %2560 = shalt.err (!%p2557_p7)
}
 0x902   :  { %s2571_s28 = smov 128   ;;  %s2572_s29 = smov 8  }
 0x903   :  { %2148 = dma.vmem_to_hbm [thread:$0]  %s2143_s23, 256, %s2989_s12, [#allocation3], %s2571_s28, %s2571_s28, %s2572_s29  }
 0x904   :  { %2561 = dma.done.wait [#allocation3], 256  }
 0x905   :  { %2562 = vsyncadd [#allocation3], 4294967040 }
 0x906   :  { %2152 = vsyncpa [#allocation3], 1 }

</bundles_post_ra>
